<compile_context>
chip_gen: v7x
topology: tpu7x:2x2x1
jax: 0.10.0
libtpu: 0.0.40
codegen_flags: <defaults>
</compile_context>

<pallas_src>
import jax
import jax.numpy as jnp
from jax import lax
from jax.experimental import pallas as pl
from jax.experimental.pallas import tpu as pltpu


def _round_up(a, b):
    return ((a + b - 1) // b) * b


def embed_kernel(p_ref, w_ref, pos_ref, o_ref):
    # p_ref:   (TM, K)   bf16 flattened patches (batch folded into rows)
    # w_ref:   (K, Hp)   bf16 projection matrix (conv weight reshaped, padded lanes)
    # pos_ref: (TM, Hp)  f32 position embeddings (+ conv bias folded in), padded lanes
    # o_ref:   (TM, Hp)  output rows (lane-dense)
    y = jnp.dot(p_ref[...], w_ref[...], preferred_element_type=jnp.float32)
    o_ref[...] = (y + pos_ref[...]).astype(o_ref.dtype)
    # TODO(synk): dropout is identity here (inference / eval mode); training-mode
    # dropout would use pltpu.prng_seed + pltpu.stateful_bernoulli.


def embeddings_forward(x, conv_w, conv_b, pos_emb, patch_size, *, row_tile=512):
    """x: (B, C, H, W) NCHW. Returns (B, n_patches, hidden_dim)."""
    B, C, H, W = x.shape
    ph, pw = patch_size
    gh, gw = H // ph, W // pw
    P = gh * gw                      # n_patches
    hidden = conv_w.shape[0]
    K = C * ph * pw
    M = B * P                        # batch folded into matmul rows

    # --- host glue: patchify, matching Conv2d(kernel=stride=patch) weight layout ---
    # (B,C,H,W) -> (B,C,gh,ph,gw,pw) -> (B,gh,gw,C,ph,pw) -> (B*P, C*ph*pw)
    # TODO(synk): at production sizes fuse this extraction into the kernel
    # (BlockSpec over (b, gh, gw) reading NCHW directly) to avoid an extra HBM pass.
    patches = x.reshape(B, C, gh, ph, gw, pw).transpose(0, 2, 4, 1, 3, 5).reshape(M, K)

    # Conv2d weight (hidden, C, ph, pw) -> (K, hidden); fold bias into pos table.
    w_flat = conv_w.reshape(hidden, K).T
    pos_plus_b = pos_emb.reshape(P, hidden) + conv_b.reshape(1, hidden)
    pos_rows = jnp.tile(pos_plus_b, (B, 1))                      # (M, hidden)

    # --- padding for lane-dense output and aligned row tiles ---
    Hp = _round_up(hidden, 128)                                  # lane-dense hidden
    TM = max(16, min(row_tile, _round_up(pl.cdiv(M, 2), 16)))    # row tile (mult of 16)
    Mp = max(_round_up(M, TM), 2 * TM)                           # >=2 parallel blocks
    n_blocks = Mp // TM

    patches_p = jnp.pad(patches, ((0, Mp - M), (0, 0))).astype(jnp.bfloat16)
    w_p = jnp.pad(w_flat, ((0, 0), (0, Hp - hidden))).astype(jnp.bfloat16)
    pos_p = jnp.pad(pos_rows, ((0, Mp - M), (0, Hp - hidden))).astype(jnp.float32)

    out_p = pl.pallas_call(
        embed_kernel,
        out_shape=jax.ShapeDtypeStruct((Mp, Hp), x.dtype),
        grid_spec=pltpu.PrefetchScalarGridSpec(
            num_scalar_prefetch=0,
            grid=(n_blocks,),
            in_specs=[
                pl.BlockSpec((TM, K), lambda i: (i, 0)),     # patch rows, per block
                pl.BlockSpec((K, Hp), lambda i: (0, 0)),     # projection weight (resident)
                pl.BlockSpec((TM, Hp), lambda i: (i, 0)),    # pos + bias rows
            ],
            out_specs=pl.BlockSpec((TM, Hp), lambda i: (i, 0)),
        ),
        compiler_params=pltpu.CompilerParams(
            dimension_semantics=("parallel",),
            vmem_limit_bytes=32 * 1024 * 1024,
        ),
    )(patches_p, w_p, pos_p)

    return out_p[:M, :hidden].reshape(B, P, hidden)


if __name__ == "__main__":
    # Module config: img_size=(256,256), grid_size=(8,8)
    #   patch_size      = (256//16//8, 256//16//8) = (2, 2)
    #   patch_size_real = (32, 32)
    #   n_patches       = (256//32) * (256//32)    = 64
    # Forward input is the 1/16-resolution feature map: (B, C, 16, 16).
    img_size = (256, 256)
    grid_size = (8, 8)
    in_channels = 4
    hidden_dim = 32

    patch_size = (img_size[0] // 16 // grid_size[0], img_size[1] // 16 // grid_size[1])
    patch_size_real = (patch_size[0] * 16, patch_size[1] * 16)
    n_patches = (img_size[0] // patch_size_real[0]) * (img_size[1] // patch_size_real[1])

    B = 2
    feat_h, feat_w = img_size[0] // 16, img_size[1] // 16

    key = jax.random.PRNGKey(0)
    k1, k2, k3, k4 = jax.random.split(key, 4)
    x = jax.random.normal(k1, (B, in_channels, feat_h, feat_w), jnp.float32)
    conv_w = 0.02 * jax.random.normal(
        k2, (hidden_dim, in_channels, patch_size[0], patch_size[1]), jnp.float32)
    conv_b = 0.02 * jax.random.normal(k3, (hidden_dim,), jnp.float32)
    # nn.Parameter(torch.zeros(1, n_patches, hidden_dim)) after some "training":
    pos_emb = 0.02 * jax.random.normal(k4, (1, n_patches, hidden_dim), jnp.float32)

    out = embeddings_forward(x, conv_w, conv_b, pos_emb, patch_size)
    out = jax.block_until_ready(out)

    # Pure-JAX f32 reference (lax.conv in NCHW) for correctness check.
    ref = lax.conv_general_dilated(
        x, conv_w, window_strides=patch_size, padding="VALID",
        dimension_numbers=("NCHW", "OIHW", "NCHW"))
    ref = ref + conv_b.reshape(1, hidden_dim, 1, 1)
    ref = ref.reshape(B, hidden_dim, n_patches).transpose(0, 2, 1) + pos_emb

    assert out.shape == (B, n_patches, hidden_dim)
    # bf16 matmul operands -> loosened tolerance vs the f32 reference.
    assert jnp.allclose(out, ref, atol=1e-2, rtol=1e-2), \
        "Pallas output mismatch vs reference"
    print("KERNEL_OK")
</pallas_src>

<mosaic_0001>
module attributes {stable_mosaic.version = 11 : i64} {
  func.func @embed_kernel(%arg0: i32, %arg1: memref<64x16xbf16, #tpu.memory_space<vmem>>, %arg2: memref<16x128xbf16, #tpu.memory_space<vmem>>, %arg3: memref<64x128xf32, #tpu.memory_space<vmem>>, %arg4: memref<64x128xf32, #tpu.memory_space<vmem>>) attributes {dimension_semantics = [#tpu.dimension_semantics<parallel>], iteration_bounds = array<i64: 2>, scalar_prefetch = 0 : i64, scratch_operands = 0 : i64, tpu.core_type = #tpu.core_type<tc>, window_params = [{transform_indices = @transform_0, window_bounds = array<i64: 64, 16>}, {pipeline_mode = #tpu.pipeline_mode<synchronous>, transform_indices = @transform_1, window_bounds = array<i64: 16, 128>}, {transform_indices = @transform_2, window_bounds = array<i64: 64, 128>}, {transform_indices = @transform_3, window_bounds = array<i64: 64, 128>}]} {
    %c0 = arith.constant 0 : index
    %c0_0 = arith.constant 0 : index
    %0 = vector.load %arg1[%c0, %c0_0] : memref<64x16xbf16, #tpu.memory_space<vmem>>, vector<64x16xbf16>
    %c0_1 = arith.constant 0 : index
    %c0_2 = arith.constant 0 : index
    %1 = vector.load %arg2[%c0_1, %c0_2] : memref<16x128xbf16, #tpu.memory_space<vmem>>, vector<16x128xbf16>
    %cst = arith.constant dense<0.000000e+00> : vector<64x128xf32>
    %2 = tpu.matmul %0, %1, %cst {dimension_numbers = #tpu.dot_dimension_numbers<[1], [0], [0], [1], [0, 0, 1, 1], [], []>} : vector<64x16xbf16>, vector<16x128xbf16>, vector<64x128xf32> -> vector<64x128xf32>
    %c0_3 = arith.constant 0 : index
    %c0_4 = arith.constant 0 : index
    %3 = vector.load %arg3[%c0_3, %c0_4] : memref<64x128xf32, #tpu.memory_space<vmem>>, vector<64x128xf32>
    %4 = arith.addf %2, %3 : vector<64x128xf32>
    %c0_5 = arith.constant 0 : index
    %c0_6 = arith.constant 0 : index
    %5 = vector.load %arg4[%c0_5, %c0_6] : memref<64x128xf32, #tpu.memory_space<vmem>>, vector<64x128xf32>
    tpu.vector_store %arg4[%c0_5, %c0_6], %4 {strides = array<i32>} : memref<64x128xf32, #tpu.memory_space<vmem>>, vector<64x128xf32>,
    return
  }
  func.func @transform_0(%arg0: i32) -> (i32, i32) {
    %c0_i32 = arith.constant 0 : i32
    %c0_i32_0 = arith.constant 0 : i32
    return %arg0, %c0_i32 : i32, i32
  }
  func.func @transform_1(%arg0: i32) -> (i32, i32) {
    %c0_i32 = arith.constant 0 : i32
    %c0_i32_0 = arith.constant 0 : i32
    %c0_i32_1 = arith.constant 0 : i32
    return %c0_i32, %c0_i32_0 : i32, i32
  }
  func.func @transform_2(%arg0: i32) -> (i32, i32) {
    %c0_i32 = arith.constant 0 : i32
    %c0_i32_0 = arith.constant 0 : i32
    return %arg0, %c0_i32 : i32, i32
  }
  func.func @transform_3(%arg0: i32) -> (i32, i32) {
    %c0_i32 = arith.constant 0 : i32
    %c0_i32_0 = arith.constant 0 : i32
    return %arg0, %c0_i32 : i32, i32
  }
}

</mosaic_0001>

<bundles_post_ra>
// kernel: tpu_custom_call.1
= control target key start
LH: loop header
LB: loop body
LE: loop exit
PB: predicated region body
PF: predicated region fallthrough
CT: control target
= control target key end

     0   :  { %8 = vsyncpa [#allocation3], 0  ;;  %s856_s0 = inlined_call_operand.vmem [shape: bf16[128,16], index: 0, kind: input, shape index: {}]   ;;  %s857_s1 = inlined_call_operand.vmem [shape: bf16[16,128], index: 1, kind: input, shape index: {}]   ;;  %s858_s2 = inlined_call_operand.hbm [shape: f32[128,128], index: 2, kind: input, shape index: {}]   ;;  %s859_s3 = inlined_call_operand.hbm [shape: f32[128,128], index: 3, kind: output, shape index: {}]  }
   0x1   :  { %10 = vsyncpa [#allocation3 + $0x1], 0 }
   0x2   :  { %11 = vsyncpa [#allocation4], 0 }
   0x3   :  { %13 = vsyncpa [#allocation4 + $0x1], 0  ;;  %s666_s12 = smov 0   ;;  %s668_s13 = smov 0  }
   0x4   :  { %s670_s14 = smov 0   ;;  %s672_s15 = smov 0  }
   0x5 LB: > { %s687_s16 = sadd.s32 4294967295, %s638_s15   ;;  %s443_s17 = sadd.s32 4294967294, %s638_s15   ;;  %s638_s15 = sphi %s672_s15, %s872_s15   ;;  %s634_s14 = sphi %s670_s14, %s871_s14   ;;  %s630_s13 = sphi %s668_s13, %s870_s13   ;;  %s626_s12 = sphi %s666_s12, %s869_s12  }
   0x6   : > { %s691_s18 = sadd.s32 1, %s638_s15   ;;  %s73_s19 = sadd.s32 1, %s634_s14 }
   0x7   : > { %s70_s20 = ssub.s32 %s638_s15, %s691_s18  ;;  %p80_p0 = scmp.ne.s32.totalorder %s634_s14, %s630_s13 }
   0x8   : > { %p71_p1 = scmp.eq.s32.totalorder %s70_s20, 0  ;;  %p81_p2 = scmp.eq.s32.totalorder %s638_s15, 0 }
   0x9   : > { %p86_p3 = scmp.ne.s32.totalorder %s630_s13, %s626_s12  ;;  %p87_p4 = scmp.eq.s32.totalorder %s687_s16, 0 }
   0xa   : > { %s703_s21 = scalar_select %p71_p1, %s634_s14, %s73_s19  }
   0xb   : > { %p705_p5 = por %p81_p2, %p80_p0  ;;  %p709_p6 = por %p87_p4, %p86_p3 }
   0xc   : > { %p110_p7 = scmp.eq.s32.totalorder %s687_s16, 1  ;;  %p116_p8 = scmp.eq.s32.totalorder %s443_s17, 1 }
   0xd   : > { %p499_p10 = scmp.lt.s32.totalorder %s638_s15, 2  ;;  %s148_s26 = sand.u32 1, %s634_s14  }
   0xe   : > { %p716_p11 = por %p110_p7, %p80_p0  ;;  %p720_p12 = por %p116_p8, %p86_p3 }
   0xf   : > { %s468_s27 = sshll.u32 %s638_s15, 10  ;;  %s446_s28 = sshll.u32 %s148_s26, 6 }
  0x10   : > { %s863_s24 = scalar_select %p716_p11, 1, 0 }
  0x11   : > { %s864_s25 = scalar_select %p720_p12, 1, 0 }
  0x12   : > { %s729_s4 = scalar_lea.hbm %s858_s2, %s468_s27  ;;  %s152_s5 = scalar_lea.vmem [#allocation2], %s446_s28 }
  0x13   : > { %s159_s6 = sshll.u32 %s152_s5, 4  ;;  %p733_p13 = pnand %p499_p10, %p705_p5  ;;  %s737_s6 = int_to_ptr.vmem [resolvable:$true] %s159_s6 }
  0x14   : > { %s739_s8 = scalar_lea.sflag [#allocation3], %s148_s26  ;;  %s542_s9 = scalar_lea.hbm %s729_s4, 1024 }
  0x15   : > { %p543_p0 = scmp.ne.s32.totalorder %s729_s4, %s542_s9  ;;  %p544_p1 = pneg %p733_p13 }
  0x16   : > { %s547_s17 = scalar_lea.hbm %s858_s2, 2048  ;;  %p548_p4 = scmp.lt.u32.totalorder %s729_s4, %s858_s2 }
  0x17   : > { %p545_p2 = pnand %p544_p1, %p543_p0  ;;  %p549_p5 = scmp.lt.u32.totalorder %s547_s17, %s542_s9 }
  0x18   : > { %p551_p8 = scmp.lt.u32.totalorder %s542_s9, %s729_s4 }
  0x19   : > { %p546_p3 = pneg %p545_p2  ;;  %p550_p7 = por %p549_p5, %p548_p4 }
  0x1b   : > { %p552_p10 = por %p551_p8, %p550_p7 }
  0x1d   : > { %p553_p9 = pnand %p552_p10, %p546_p3 }
  0x1f   : > { %556 = shalt.err (!%p553_p9)
}
  0x20   : > { %s557_s22 = scalar_lea.vmem %s737_s6, 1024  ;;  %s640_s26 = smov [#allocation2]  }
  0x21   : > { %p558_p0 = scmp.ne.s32.totalorder %s737_s6, %s557_s22  ;;  %s562_s27 = sshll.u32 %s640_s26, 4  ;;  %s563_s27 = int_to_ptr.vmem [resolvable:$false] %s562_s27 }
  0x22   : > { %s564_s28 = scalar_lea.vmem %s563_s27, 2048  ;;  %p565_p11 = scmp.lt.s32.totalorder %s737_s6, %s563_s27 }
  0x23   : > { %p560_p2 = pnand %p558_p0, %p544_p1  ;;  %p566_p4 = scmp.lt.s32.totalorder %s564_s28, %s557_s22 }
  0x25   : > { %p561_p12 = pneg %p560_p2  ;;  %p567_p5 = por %p566_p4, %p565_p11 }
  0x27   : > { %p568_p7 = pnand %p567_p5, %p561_p12 }
  0x29   : > { %571 = shalt.err (!%p568_p7)
}
  0x2a   : > { %s641_s29 = smov 128   ;;  %s642_s30 = smov 8  }
  0x2b   : > { %494 = dma.hbm_to_vmem [thread:$0]  (!%p733_p13), %s729_s4, 1024, %s737_s6, %s739_s8, %s641_s29, %s641_s29, %s642_s30  }
  0x2c   : > { %p449_p9 = scmp.ge.s32.totalorder %s638_s15, 1  ;;  %p167_p1 = scmp.lt.s32.totalorder %s638_s15, 3 }
  0x2e   : > { %p168_p3 = pnand %p449_p9, %p167_p1 }
  0x2f   : > { %s770_s5 = sand.u32 (!%p168_p3), 1, %s630_s13  }
  0x30   : > { %171 = sbr.rel (%p168_p3) target bundleno = 296 (0x128), region = 32  ;;  %s450_s9 = sshll.u32 (!%p168_p3), %s770_s5, 6 }
  0x31   : > { %s174_s10 = scalar_lea.sflag (!%p168_p3), [#allocation3], %s770_s5  ;;  %s774_s11 = scalar_lea.vmem (!%p168_p3), [#allocation2], %s450_s9 }
  0x37   : > { %617 = dma.done.wait (%p709_p6), %s174_s10, 1024  }
  0x38   : > { %619 = vsyncadd (%p709_p6), %s174_s10, 4294966272  ;;  %s452_s4 = sshll.u32 %s687_s16, 3  ;;  %v537_v0 = vld [vmem:[%s857_s1] sm:$0xff]   ;;  %vm258_vm0 = vcmask 130048   ;;  %v226_v5 = vld [vmem:[%s774_s11 + $0x10] sm:$0xff]  ;;  %s789_s23 = scalar_lea.vmem [#allocation5], %s450_s9 }
  0x39   : > { %p206_p11 = scmp.lt.s32.totalorder %s452_s4, 15  ;;  %475 = vmatprep.subr.bf16.mxu0 %v537_v0  ;;  %485 = vmatprep.subr.bf16.mxu1 %v537_v0  ;;  %v230_v6 = vld [vmem:[%s774_s11 + $0x30] sm:$0xff]  ;;  %s358_s22 = sshll.u32 %s789_s23, 4  ;;  %v224_v7 = vld [vmem:[%s774_s11] sm:$0xff]  ;;  %v227_v11 = vld [vmem:[%s774_s11 + $0x18] sm:$0xff]  ;;  %s799_s22 = int_to_ptr.vmem [resolvable:$true] %s358_s22 }
  0x3a   : > { %476 = vmatpush3.bf16.msra.mxu0 %v537_v0  ;;  %486 = vmatpush3.bf16.msra.mxu1 %v537_v0  ;;  %v228_v8 = vld [vmem:[%s774_s11 + $0x20] sm:$0xff]  ;;  %v231_v12 = vld [vmem:[%s774_s11 + $0x38] sm:$0xff]  ;;  %s469_s26 = sshll.u32 %s687_s16, 10  ;;  %v225_v17 = vld [vmem:[%s774_s11 + $0x8] sm:$0xff]  ;;  %s345_s29 = scalar_lea.sflag [#allocation4], %s770_s5 }
  0x3b   : > { %s874_s4 = smov (!%p206_p11, %s452_s4), 15  ;;  %v229_v18 = vld [vmem:[%s774_s11 + $0x28] sm:$0xff]  ;;  %s806_s28 = scalar_lea.hbm %s859_s3, %s469_s26 }
  0x3c   : > { %s453_s6 = sshll.u32 %s874_s4, 2  ;;  %s572_s30 = scalar_lea.vmem %s799_s22, 1024 }
  0x3d   : > { %s209_s17 = scalar_lea.vmem %s856_s0, %s453_s6  ;;  %p573_p6 = scmp.ne.s32.totalorder %s799_s22, %s572_s30 }
  0x3e   : > { %v538_v1 = vld [vmem:[%s209_s17] sm:$0xff]   ;;  %v539_v2 = vld [vmem:[%s209_s17 + $0x10] sm:$0xff]   ;;  %v540_v3 = vld [vmem:[%s209_s17 + $0x8] sm:$0xff]   ;;  %p866_p12 = scmp.ne.s32.totalorder %s863_s24, 0  ;;  %s643_s9 = smov [#allocation5]  }
  0x3f   : > { %477 = vmatprep.mubr.msk.bf16.mxu0 %vm258_vm0, %v538_v1  ;;  %481 = vmatprep.mubr.msk.bf16.mxu1 %vm258_vm0, %v539_v2  ;;  %v541_v4 = vld [vmem:[%s209_s17 + $0x18] sm:$0xff]   ;;  %s576_s10 = sshll.u32 %s643_s9, 4  ;;  %s577_s10 = int_to_ptr.vmem [resolvable:$false] %s576_s10 }
  0x40   : > { %478 = vmatmul.mubr.msk.bf16.vlgmr.msra.gmra.mrb[0].mxu0 %vm258_vm0, %v540_v3  ;;  %482 = vmatmul.mubr.msk.bf16.vlgmr.msra.gmra.mrb[0].mxu1 %vm258_vm0, %v541_v4  ;;  %p574_p13 = pnand %p573_p6, %p866_p12  ;;  %s578_s11 = scalar_lea.vmem %s577_s10, 2048 }
  0x41   : > { %p579_p10 = scmp.lt.s32.totalorder %s799_s22, %s577_s10  ;;  %p580_p0 = scmp.lt.s32.totalorder %s578_s11, %s572_s30 }
  0x42   : > { %p575_p8 = pneg %p574_p13 }
  0x43   : > { %p581_p2 = por %p580_p0, %p579_p10 }
  0x45   : > { %p582_p4 = pnand %p581_p2, %p575_p8 }
 0x113   : > { %v479_v9 = vpop.f32.mrb[0].mxu0  ;;  %v483_v10 = vpop.f32.mrb[0].mxu1 }
 0x114   : > { %v314_v13 = vadd.f32 %v479_v9, %v226_v5  ;;  %v330_v14 = vadd.f32 %v483_v10, %v230_v6  ;;  %v305_v15 = vpop.f32.mrb[1].mxu0  ;;  %v321_v16 = vpop.f32.mrb[1].mxu1 }
 0x115   : > { %v306_v19 = vadd.f32 %v305_v15, %v224_v7  ;;  %v322_v20 = vadd.f32 %v321_v16, %v228_v8  ;;  %v480_v21 = vpop.f32.mrb[2].mxu0  ;;  %v484_v22 = vpop.f32.mrb[2].mxu1 }
 0x116   : > { %338 = vst [vmem:[%s789_s23 + $0x10] sm:$0xff] %v314_v13  ;;  %342 = vst [vmem:[%s789_s23 + $0x30] sm:$0xff] %v330_v14  ;;  %v317_v23 = vadd.f32 %v480_v21, %v227_v11  ;;  %v333_v24 = vadd.f32 %v484_v22, %v231_v12  ;;  %v308_v25 = vpop.f32.mrb[3].mxu0  ;;  %v324_v26 = vpop.f32.mrb[3].mxu1 }
 0x117   : > { %336 = vst [vmem:[%s789_s23] sm:$0xff] %v306_v19  ;;  %340 = vst [vmem:[%s789_s23 + $0x20] sm:$0xff] %v322_v20  ;;  %v309_v27 = vadd.f32 %v308_v25, %v225_v17  ;;  %v325_v28 = vadd.f32 %v324_v26, %v229_v18 }
 0x118   : > { %339 = vst [vmem:[%s789_s23 + $0x18] sm:$0xff] %v317_v23  ;;  %343 = vst [vmem:[%s789_s23 + $0x38] sm:$0xff] %v333_v24 }
 0x119   : > { %337 = vst [vmem:[%s789_s23 + $0x8] sm:$0xff] %v309_v27  ;;  %341 = vst [vmem:[%s789_s23 + $0x28] sm:$0xff] %v325_v28 }
 0x11a   : > { %585 = shalt.err (!%p582_p4)
}
 0x11b   : > { %s586_s4 = scalar_lea.hbm %s806_s28, 1024  ;;  %s590_s8 = scalar_lea.hbm %s859_s3, 2048 }
 0x11c   : > { %p587_p5 = scmp.ne.s32.totalorder %s806_s28, %s586_s4  ;;  %p591_p1 = scmp.lt.u32.totalorder %s806_s28, %s859_s3 }
 0x11d   : > { %p592_p3 = scmp.lt.u32.totalorder %s590_s8, %s586_s4  ;;  %p594_p6 = scmp.lt.u32.totalorder %s586_s4, %s806_s28 }
 0x11e   : > { %p588_p7 = pnand %p587_p5, %p866_p12 }
 0x11f   : > { %p593_p11 = por %p592_p3, %p591_p1 }
 0x120   : > { %p589_p9 = pneg %p588_p7 }
 0x121   : > { %p595_p13 = por %p594_p6, %p593_p11 }
 0x123   : > { %p596_p8 = pnand %p595_p13, %p589_p9 }
 0x125   : > { %599 = shalt.err (!%p596_p8)
}
 0x126   : > { %s644_s20 = smov 128   ;;  %s645_s23 = smov 8  }
 0x127   : > { %489 = dma.vmem_to_hbm [thread:$0]  (%p866_p12), %s799_s22, 1024, %s806_s28, %s345_s29, %s644_s20, %s644_s20, %s645_s23  }
 0x128 PF: > { %s373_s26 = sand.u32 1, %s626_s12   ;;  %p867_p10 = scmp.ne.s32.totalorder %s864_s25, 0 }
 0x129   : > { %p868_p0 = scmp.ge.s32.totalorder %s638_s15, 2  ;;  %s374_s16 = scalar_lea.sflag [#allocation4], %s373_s26 }
 0x12b   : > { %p496_p2 = pnand %p868_p0, %p867_p10 }
 0x12d   : > { %621 = dma.done.wait (!%p496_p2), %s374_s16, 1024  }
 0x12e   : > { %623 = vsyncadd (!%p496_p2), %s374_s16, 4294966272  ;;  %p16_p4 = scmp.ge.s32.totalorder %s691_s18, 4   ;;  %s869_s12 = smov %s630_s13 }
 0x12f   : > { %s870_s13 = smov %s634_s14  ;;  %s871_s14 = smov %s703_s21 }
 0x130   : > { %s872_s15 = smov %s691_s18  ;;  %18 = sbr.rel (!%p16_p4) target bundleno = 5 (0x5), region = 80 }
 0x137   :  { %379 = vsyncpa [#allocation3], 1 }
 0x138   :  { %381 = vsyncpa [#allocation3 + $0x1], 1 }
 0x139   :  { %382 = vsyncpa [#allocation4], 1 }
 0x13a   :  { %384 = vsyncpa [#allocation4 + $0x1], 1 }

</bundles_post_ra>
